<compile_context>
chip_gen: v6e
topology: v6e:2x2x1
jax: 0.10.0
libtpu: 0.0.40
codegen_flags: <defaults>
</compile_context>

<pallas_src>
import math
import jax
import jax.numpy as jnp
from jax.experimental import pallas as pl
from jax.experimental.pallas import tpu as pltpu

MATMUL_DTYPE = jnp.bfloat16   # MXU input dtype; accumulation / residual stay f32


def _make_mrf_kernel(C, W, l_tile, H, L_total, kernel_sizes, dilations):
    """Fused MRF on one halo'd (C, W) window; writes the centre (C, l_tile) tile."""
    n_rb = len(kernel_sizes)
    n_d = len(dilations)

    def kernel(x_ref, b_ref, *w_and_out):
        w_refs = w_and_out[:n_rb]       # each: (n_d, K, C, C) bf16
        o_ref = w_and_out[n_rb]

        t = pl.program_id(1)
        win = x_ref[0, 0].astype(jnp.float32)                       # (C, W), L on lanes

        # Original-sequence column of every window lane.  Only used to keep the
        # out-of-range halo columns of the first/last tiles at exactly zero (the
        # reference zero-pads every conv at the true sequence edges); on interior
        # tiles the mask is all-true.
        col = jax.lax.broadcasted_iota(jnp.int32, (1, W), 1) + (t * l_tile - H)
        in_range = (col >= 0) & (col < L_total)                      # (1, W) bool

        out_acc = jnp.zeros((C, l_tile), jnp.float32)
        for rb in range(n_rb):                                       # static unroll
            K = kernel_sizes[rb]
            h = win                                                  # every resblock starts from x
            left = 0                                                 # window col of h[:, 0]
            width = W
            for db in range(n_d):                                    # static unroll
                d = dilations[db]
                total = d * (K - 1)
                p_left = total // 2                                  # PyTorch 'same' convention
                w_new = width - total
                # leaky_relu then ONE cast to bf16 before any tap slicing.
                a = jnp.maximum(h, 0.1 * h).astype(MATMUL_DTYPE)     # (C, width) bf16
                y = jnp.zeros((C, w_new), jnp.float32)
                for k in range(K):                                   # static unroll
                    tap = a[:, k * d: k * d + w_new]                 # halo slice, no mask
                    y = y + jnp.dot(w_refs[rb][db, k], tap,
                                    preferred_element_type=jnp.float32)
                j = rb * n_d + db
                bias = b_ref[:, j:j + 1]                             # (C, 1) f32
                left += p_left
                # Single masked update keeps true-edge halo columns at zero.
                upd = jnp.where(in_range[:, left:left + w_new], y + bias, 0.0)
                h = h[:, p_left:p_left + w_new] + upd                # residual in f32
                width = w_new
            off = H - left                                           # centre of this resblock
            out_acc = out_acc + h[:, off:off + l_tile]
        o_ref[0] = (out_acc * (1.0 / n_rb)).astype(o_ref.dtype)

    return kernel


def mrf_forward(x_ncl, params, kernel_sizes, dilations, *, l_tile=128,
                vmem_limit_bytes=None):
    """MRF forward. x_ncl: (N, C, L) as in PyTorch Conv1d; returns (N, C, L).

    l_tile should be a multiple of 128 (lane-dense output stores); pick it per
    generation so the (C, l_tile + 2H) working set + weights fit scoped VMEM.
    """
    B, C, L = x_ncl.shape
    n_rb = len(kernel_sizes)
    n_d = len(dilations)

    # Per-resblock cumulative 'same' pads (left/right) -> halo size H.
    lefts, rights = [], []
    for K in kernel_sizes:
        tot = [d * (K - 1) for d in dilations]
        lefts.append(sum(t // 2 for t in tot))
        rights.append(sum(t - t // 2 for t in tot))
    H = max(max(lefts), max(rights))

    T = pl.cdiv(L, l_tile)
    Lp = T * l_tile
    W = l_tile + 2 * H

    # One-time zero pad (sequence-edge 'same' padding + round L up to the tile),
    # then materialise halo'd windows so BlockSpec auto-pipelining streams them.
    xp = jnp.pad(x_ncl, ((0, 0), (0, 0), (H, H + Lp - L)))
    x_win = jnp.stack([xp[:, :, t * l_tile: t * l_tile + W] for t in range(T)],
                      axis=1)                                        # (B, T, C, W)

    # Biases packed lane-dense: one (C, n_rb*n_d) f32 block instead of many (C,1).
    b_all = jnp.stack([params[rb][db][1] for rb in range(n_rb) for db in range(n_d)],
                      axis=1).astype(jnp.float32)                    # (C, n_rb*n_d)

    inputs = [x_win, b_all]
    in_specs = [
        pl.BlockSpec((1, 1, C, W), lambda b, t: (b, t, 0, 0)),
        pl.BlockSpec((C, n_rb * n_d), lambda b, t: (0, 0)),
    ]
    for rb in range(n_rb):
        K = kernel_sizes[rb]
        # (n_d, K, C_out, C_in) bf16: tap k of dilation db is one (C, C) MXU operand.
        w_stack = jnp.stack(
            [jnp.transpose(params[rb][db][0], (2, 0, 1)) for db in range(n_d)],
            axis=0).astype(MATMUL_DTYPE)
        inputs.append(w_stack)
        in_specs.append(pl.BlockSpec((n_d, K, C, C), lambda b, t: (0, 0, 0, 0)))

    kernel = _make_mrf_kernel(C, W, l_tile, H, L, kernel_sizes, dilations)
    out = pl.pallas_call(
        kernel,
        out_shape=jax.ShapeDtypeStruct((B, C, Lp), x_ncl.dtype),
        grid=(B, T),
        in_specs=in_specs,
        out_specs=pl.BlockSpec((1, C, l_tile), lambda b, t: (b, 0, t)),
        compiler_params=pltpu.CompilerParams(
            dimension_semantics=("parallel", "parallel"),
            vmem_limit_bytes=vmem_limit_bytes),
    )(*inputs)
    return out if Lp == L else out[:, :, :L]


def init_mrf_params(key, channels, kernel_sizes, dilations):
    """Deterministic synthetic init mirroring weight_norm(Conv1d) + init_weights(N(0, 0.01))."""
    params = []
    for ks in kernel_sizes:
        blocks = []
        for _d in dilations:
            key, k1, k2 = jax.random.split(key, 3)
            v = 0.01 * jax.random.normal(k1, (channels, channels, ks), jnp.float32)
            # weight_norm: w = g * v / ||v|| with g initialized to ||v|| (per out channel)
            norm = jnp.sqrt(jnp.sum(v * v, axis=(1, 2), keepdims=True)) + 1e-12
            g = norm
            w = g * v / norm
            bound = 1.0 / math.sqrt(channels * ks)
            b = jax.random.uniform(k2, (channels,), jnp.float32, -bound, bound)
            blocks.append((w, b))
        params.append(blocks)
    return params


def mrf_reference(x_ncl, params, kernel_sizes, dilations):
    """Pure-JAX f32 reference (lax.conv_general_dilated) matching PyTorch semantics."""
    out = None
    for rb, ks in enumerate(kernel_sizes):
        h = x_ncl
        for db, d in enumerate(dilations):
            w, b = params[rb][db]
            a = jnp.where(h > 0, h, 0.1 * h)
            total = d * (ks - 1)
            pad_l = total // 2
            pad_r = total - pad_l
            y = jax.lax.conv_general_dilated(
                a, w, window_strides=(1,), padding=[(pad_l, pad_r)],
                rhs_dilation=(d,), dimension_numbers=("NCH", "OIH", "NCH"))
            h = h + y + b[None, :, None]
        out = h if out is None else out + h
    return out / float(len(kernel_sizes))


if __name__ == "__main__":
    # Small but tiling-exercising shapes: 2 length tiles of 128 lanes each.
    B, C, L = 2, 8, 256
    kernel_sizes = [3, 5]
    dilations = [1, 2]

    key = jax.random.PRNGKey(0)
    key, kx, kp = jax.random.split(key, 3)
    x = jax.random.normal(kx, (B, C, L), jnp.float32)   # PyTorch Conv1d NCL input
    params = init_mrf_params(kp, C, kernel_sizes, dilations)

    out = jax.block_until_ready(mrf_forward(x, params, kernel_sizes, dilations, l_tile=128))
    ref = jax.block_until_ready(mrf_reference(x, params, kernel_sizes, dilations))

    assert out.shape == (B, C, L)
    # bf16 matmul inputs (f32 accumulation / residual): loosen tolerance vs f32 ref.
    assert jnp.allclose(out, ref, atol=1e-2, rtol=1e-2), "mismatch vs pure-JAX reference"

    print("KERNEL_OK")
</pallas_src>

<mosaic_0001>
module attributes {stable_mosaic.version = 11 : i64} {
  func.func @kernel(%arg0: i32, %arg1: i32, %arg2: memref<1x1x8x140xf32, #tpu.memory_space<vmem>>, %arg3: memref<8x4xf32, #tpu.memory_space<vmem>>, %arg4: memref<2x3x8x8xbf16, #tpu.memory_space<vmem>>, %arg5: memref<2x5x8x8xbf16, #tpu.memory_space<vmem>>, %arg6: memref<1x8x128xf32, #tpu.memory_space<vmem>>) attributes {dimension_semantics = [#tpu.dimension_semantics<parallel>, #tpu.dimension_semantics<parallel>], iteration_bounds = array<i64: 2, 2>, scalar_prefetch = 0 : i64, scratch_operands = 0 : i64, tpu.core_type = #tpu.core_type<tc>, window_params = [{transform_indices = @transform_0, window_bounds = array<i64: 1, 1, 8, 140>}, {pipeline_mode = #tpu.pipeline_mode<synchronous>, transform_indices = @transform_1, window_bounds = array<i64: 8, 4>}, {pipeline_mode = #tpu.pipeline_mode<synchronous>, transform_indices = @transform_2, window_bounds = array<i64: 2, 3, 8, 8>}, {pipeline_mode = #tpu.pipeline_mode<synchronous>, transform_indices = @transform_3, window_bounds = array<i64: 2, 5, 8, 8>}, {transform_indices = @transform_4, window_bounds = array<i64: 1, 8, 128>}]} {
    %c0 = arith.constant 0 : index
    %c0_0 = arith.constant 0 : index
    %c0_1 = arith.constant 0 : index
    %c0_2 = arith.constant 0 : index
    %0 = vector.load %arg2[%c0, %c0_0, %c0_1, %c0_2] : memref<1x1x8x140xf32, #tpu.memory_space<vmem>>, vector<1x1x8x140xf32>
    %1 = vector.shape_cast %0 : vector<1x1x8x140xf32> to vector<8x140xf32>
    %2 = tpu.iota {dimensions = array<i32: 1>} : vector<1x140xi32>
    %c128_i32 = arith.constant 128 : i32
    %3 = arith.muli %arg1, %c128_i32 : i32
    %c6_i32 = arith.constant 6 : i32
    %4 = arith.subi %3, %c6_i32 : i32
    %5 = vector.broadcast %4 : i32 to vector<1x140xi32>
    %6 = arith.addi %2, %5 : vector<1x140xi32>
    %c0_i32 = arith.constant 0 : i32
    %7 = vector.broadcast %c0_i32 : i32 to vector<1x140xi32>
    %8 = arith.cmpi sge, %6, %7 : vector<1x140xi32>
    %c256_i32 = arith.constant 256 : i32
    %9 = vector.broadcast %c256_i32 : i32 to vector<1x140xi32>
    %10 = arith.cmpi slt, %6, %9 : vector<1x140xi32>
    %11 = arith.andi %8, %10 : vector<1x140xi1>
    %cst = arith.constant 0.000000e+00 : f32
    %12 = vector.broadcast %cst : f32 to vector<8x128xf32>
    %cst_3 = arith.constant 1.000000e-01 : f32
    %13 = vector.broadcast %cst_3 : f32 to vector<8x140xf32>
    %14 = arith.mulf %13, %1 : vector<8x140xf32>
    %15 = arith.maximumf %1, %14 : vector<8x140xf32>
    %16 = arith.truncf %15 : vector<8x140xf32> to vector<8x140xbf16>
    %cst_4 = arith.constant 0.000000e+00 : f32
    %17 = vector.broadcast %cst_4 : f32 to vector<8x138xf32>
    %18 = vector.extract_strided_slice %16 {offsets = [0, 0], sizes = [8, 138], strides = [1, 1]} : vector<8x140xbf16> to vector<8x138xbf16>
    %c0_5 = arith.constant 0 : index
    %c0_6 = arith.constant 0 : index
    %c0_7 = arith.constant 0 : index
    %c0_8 = arith.constant 0 : index
    %19 = vector.load %arg4[%c0_5, %c0_6, %c0_7, %c0_8] : memref<2x3x8x8xbf16, #tpu.memory_space<vmem>>, vector<1x1x8x8xbf16>
    %20 = vector.shape_cast %19 : vector<1x1x8x8xbf16> to vector<8x8xbf16>
    %cst_9 = arith.constant dense<0.000000e+00> : vector<8x138xf32>
    %21 = tpu.matmul %20, %18, %cst_9 {dimension_numbers = #tpu.dot_dimension_numbers<[1], [0], [0], [1], [0, 0, 1, 1], [], []>} : vector<8x8xbf16>, vector<8x138xbf16>, vector<8x138xf32> -> vector<8x138xf32>
    %22 = arith.addf %17, %21 : vector<8x138xf32>
    %23 = vector.extract_strided_slice %16 {offsets = [0, 1], sizes = [8, 138], strides = [1, 1]} : vector<8x140xbf16> to vector<8x138xbf16>
    %c0_10 = arith.constant 0 : index
    %c1 = arith.constant 1 : index
    %c0_11 = arith.constant 0 : index
    %c0_12 = arith.constant 0 : index
    %24 = vector.load %arg4[%c0_10, %c1, %c0_11, %c0_12] : memref<2x3x8x8xbf16, #tpu.memory_space<vmem>>, vector<1x1x8x8xbf16>
    %25 = vector.shape_cast %24 : vector<1x1x8x8xbf16> to vector<8x8xbf16>
    %cst_13 = arith.constant dense<0.000000e+00> : vector<8x138xf32>
    %26 = tpu.matmul %25, %23, %cst_13 {dimension_numbers = #tpu.dot_dimension_numbers<[1], [0], [0], [1], [0, 0, 1, 1], [], []>} : vector<8x8xbf16>, vector<8x138xbf16>, vector<8x138xf32> -> vector<8x138xf32>
    %27 = arith.addf %22, %26 : vector<8x138xf32>
    %28 = vector.extract_strided_slice %16 {offsets = [0, 2], sizes = [8, 138], strides = [1, 1]} : vector<8x140xbf16> to vector<8x138xbf16>
    %c0_14 = arith.constant 0 : index
    %c2 = arith.constant 2 : index
    %c0_15 = arith.constant 0 : index
    %c0_16 = arith.constant 0 : index
    %29 = vector.load %arg4[%c0_14, %c2, %c0_15, %c0_16] : memref<2x3x8x8xbf16, #tpu.memory_space<vmem>>, vector<1x1x8x8xbf16>
    %30 = vector.shape_cast %29 : vector<1x1x8x8xbf16> to vector<8x8xbf16>
    %cst_17 = arith.constant dense<0.000000e+00> : vector<8x138xf32>
    %31 = tpu.matmul %30, %28, %cst_17 {dimension_numbers = #tpu.dot_dimension_numbers<[1], [0], [0], [1], [0, 0, 1, 1], [], []>} : vector<8x8xbf16>, vector<8x138xbf16>, vector<8x138xf32> -> vector<8x138xf32>
    %32 = arith.addf %27, %31 : vector<8x138xf32>
    %c0_18 = arith.constant 0 : index
    %c0_19 = arith.constant 0 : index
    %33 = vector.load %arg3[%c0_18, %c0_19] : memref<8x4xf32, #tpu.memory_space<vmem>>, vector<8x1xf32>
    %34 = vector.extract_strided_slice %11 {offsets = [0, 1], sizes = [1, 138], strides = [1, 1]} : vector<1x140xi1> to vector<1x138xi1>
    %35 = vector.broadcast %33 : vector<8x1xf32> to vector<8x138xf32>
    %36 = arith.addf %32, %35 : vector<8x138xf32>
    %cst_20 = arith.constant 0.000000e+00 : f32
    %37 = vector.shape_cast %34 : vector<1x138xi1> to vector<1x138xi1>
    %38 = vector.broadcast %37 : vector<1x138xi1> to vector<8x138xi1>
    %39 = vector.broadcast %cst_20 : f32 to vector<8x138xf32>
    %40 = arith.select %38, %36, %39 : vector<8x138xi1>, vector<8x138xf32>
    %41 = vector.extract_strided_slice %1 {offsets = [0, 1], sizes = [8, 138], strides = [1, 1]} : vector<8x140xf32> to vector<8x138xf32>
    %42 = arith.addf %41, %40 : vector<8x138xf32>
    %cst_21 = arith.constant 1.000000e-01 : f32
    %43 = vector.broadcast %cst_21 : f32 to vector<8x138xf32>
    %44 = arith.mulf %43, %42 : vector<8x138xf32>
    %45 = arith.maximumf %42, %44 : vector<8x138xf32>
    %46 = arith.truncf %45 : vector<8x138xf32> to vector<8x138xbf16>
    %cst_22 = arith.constant 0.000000e+00 : f32
    %47 = vector.broadcast %cst_22 : f32 to vector<8x134xf32>
    %48 = vector.extract_strided_slice %46 {offsets = [0, 0], sizes = [8, 134], strides = [1, 1]} : vector<8x138xbf16> to vector<8x134xbf16>
    %c1_23 = arith.constant 1 : index
    %c0_24 = arith.constant 0 : index
    %c0_25 = arith.constant 0 : index
    %c0_26 = arith.constant 0 : index
    %49 = vector.load %arg4[%c1_23, %c0_24, %c0_25, %c0_26] : memref<2x3x8x8xbf16, #tpu.memory_space<vmem>>, vector<1x1x8x8xbf16>
    %50 = vector.shape_cast %49 : vector<1x1x8x8xbf16> to vector<8x8xbf16>
    %cst_27 = arith.constant dense<0.000000e+00> : vector<8x134xf32>
    %51 = tpu.matmul %50, %48, %cst_27 {dimension_numbers = #tpu.dot_dimension_numbers<[1], [0], [0], [1], [0, 0, 1, 1], [], []>} : vector<8x8xbf16>, vector<8x134xbf16>, vector<8x134xf32> -> vector<8x134xf32>
    %52 = arith.addf %47, %51 : vector<8x134xf32>
    %53 = vector.extract_strided_slice %46 {offsets = [0, 2], sizes = [8, 134], strides = [1, 1]} : vector<8x138xbf16> to vector<8x134xbf16>
    %c1_28 = arith.constant 1 : index
    %c1_29 = arith.constant 1 : index
    %c0_30 = arith.constant 0 : index
    %c0_31 = arith.constant 0 : index
    %54 = vector.load %arg4[%c1_28, %c1_29, %c0_30, %c0_31] : memref<2x3x8x8xbf16, #tpu.memory_space<vmem>>, vector<1x1x8x8xbf16>
    %55 = vector.shape_cast %54 : vector<1x1x8x8xbf16> to vector<8x8xbf16>
    %cst_32 = arith.constant dense<0.000000e+00> : vector<8x134xf32>
    %56 = tpu.matmul %55, %53, %cst_32 {dimension_numbers = #tpu.dot_dimension_numbers<[1], [0], [0], [1], [0, 0, 1, 1], [], []>} : vector<8x8xbf16>, vector<8x134xbf16>, vector<8x134xf32> -> vector<8x134xf32>
    %57 = arith.addf %52, %56 : vector<8x134xf32>
    %58 = vector.extract_strided_slice %46 {offsets = [0, 4], sizes = [8, 134], strides = [1, 1]} : vector<8x138xbf16> to vector<8x134xbf16>
    %c1_33 = arith.constant 1 : index
    %c2_34 = arith.constant 2 : index
    %c0_35 = arith.constant 0 : index
    %c0_36 = arith.constant 0 : index
    %59 = vector.load %arg4[%c1_33, %c2_34, %c0_35, %c0_36] : memref<2x3x8x8xbf16, #tpu.memory_space<vmem>>, vector<1x1x8x8xbf16>
    %60 = vector.shape_cast %59 : vector<1x1x8x8xbf16> to vector<8x8xbf16>
    %cst_37 = arith.constant dense<0.000000e+00> : vector<8x134xf32>
    %61 = tpu.matmul %60, %58, %cst_37 {dimension_numbers = #tpu.dot_dimension_numbers<[1], [0], [0], [1], [0, 0, 1, 1], [], []>} : vector<8x8xbf16>, vector<8x134xbf16>, vector<8x134xf32> -> vector<8x134xf32>
    %62 = arith.addf %57, %61 : vector<8x134xf32>
    %c0_38 = arith.constant 0 : index
    %c1_39 = arith.constant 1 : index
    %63 = vector.load %arg3[%c0_38, %c1_39] : memref<8x4xf32, #tpu.memory_space<vmem>>, vector<8x1xf32>
    %64 = vector.extract_strided_slice %11 {offsets = [0, 3], sizes = [1, 134], strides = [1, 1]} : vector<1x140xi1> to vector<1x134xi1>
    %65 = vector.broadcast %63 : vector<8x1xf32> to vector<8x134xf32>
    %66 = arith.addf %62, %65 : vector<8x134xf32>
    %cst_40 = arith.constant 0.000000e+00 : f32
    %67 = vector.shape_cast %64 : vector<1x134xi1> to vector<1x134xi1>
    %68 = vector.broadcast %67 : vector<1x134xi1> to vector<8x134xi1>
    %69 = vector.broadcast %cst_40 : f32 to vector<8x134xf32>
    %70 = arith.select %68, %66, %69 : vector<8x134xi1>, vector<8x134xf32>
    %71 = vector.extract_strided_slice %42 {offsets = [0, 2], sizes = [8, 134], strides = [1, 1]} : vector<8x138xf32> to vector<8x134xf32>
    %72 = arith.addf %71, %70 : vector<8x134xf32>
    %73 = vector.extract_strided_slice %72 {offsets = [0, 3], sizes = [8, 128], strides = [1, 1]} : vector<8x134xf32> to vector<8x128xf32>
    %74 = arith.addf %12, %73 : vector<8x128xf32>
    %cst_41 = arith.constant 1.000000e-01 : f32
    %75 = vector.broadcast %cst_41 : f32 to vector<8x140xf32>
    %76 = arith.mulf %75, %1 : vector<8x140xf32>
    %77 = arith.maximumf %1, %76 : vector<8x140xf32>
    %78 = arith.truncf %77 : vector<8x140xf32> to vector<8x140xbf16>
    %cst_42 = arith.constant 0.000000e+00 : f32
    %79 = vector.broadcast %cst_42 : f32 to vector<8x136xf32>
    %80 = vector.extract_strided_slice %78 {offsets = [0, 0], sizes = [8, 136], strides = [1, 1]} : vector<8x140xbf16> to vector<8x136xbf16>
    %c0_43 = arith.constant 0 : index
    %c0_44 = arith.constant 0 : index
    %c0_45 = arith.constant 0 : index
    %c0_46 = arith.constant 0 : index
    %81 = vector.load %arg5[%c0_43, %c0_44, %c0_45, %c0_46] : memref<2x5x8x8xbf16, #tpu.memory_space<vmem>>, vector<1x1x8x8xbf16>
    %82 = vector.shape_cast %81 : vector<1x1x8x8xbf16> to vector<8x8xbf16>
    %cst_47 = arith.constant dense<0.000000e+00> : vector<8x136xf32>
    %83 = tpu.matmul %82, %80, %cst_47 {dimension_numbers = #tpu.dot_dimension_numbers<[1], [0], [0], [1], [0, 0, 1, 1], [], []>} : vector<8x8xbf16>, vector<8x136xbf16>, vector<8x136xf32> -> vector<8x136xf32>
    %84 = arith.addf %79, %83 : vector<8x136xf32>
    %85 = vector.extract_strided_slice %78 {offsets = [0, 1], sizes = [8, 136], strides = [1, 1]} : vector<8x140xbf16> to vector<8x136xbf16>
    %c0_48 = arith.constant 0 : index
    %c1_49 = arith.constant 1 : index
    %c0_50 = arith.constant 0 : index
    %c0_51 = arith.constant 0 : index
    %86 = vector.load %arg5[%c0_48, %c1_49, %c0_50, %c0_51] : memref<2x5x8x8xbf16, #tpu.memory_space<vmem>>, vector<1x1x8x8xbf16>
    %87 = vector.shape_cast %86 : vector<1x1x8x8xbf16> to vector<8x8xbf16>
    %cst_52 = arith.constant dense<0.000000e+00> : vector<8x136xf32>
    %88 = tpu.matmul %87, %85, %cst_52 {dimension_numbers = #tpu.dot_dimension_numbers<[1], [0], [0], [1], [0, 0, 1, 1], [], []>} : vector<8x8xbf16>, vector<8x136xbf16>, vector<8x136xf32> -> vector<8x136xf32>
    %89 = arith.addf %84, %88 : vector<8x136xf32>
    %90 = vector.extract_strided_slice %78 {offsets = [0, 2], sizes = [8, 136], strides = [1, 1]} : vector<8x140xbf16> to vector<8x136xbf16>
    %c0_53 = arith.constant 0 : index
    %c2_54 = arith.constant 2 : index
    %c0_55 = arith.constant 0 : index
    %c0_56 = arith.constant 0 : index
    %91 = vector.load %arg5[%c0_53, %c2_54, %c0_55, %c0_56] : memref<2x5x8x8xbf16, #tpu.memory_space<vmem>>, vector<1x1x8x8xbf16>
    %92 = vector.shape_cast %91 : vector<1x1x8x8xbf16> to vector<8x8xbf16>
    %cst_57 = arith.constant dense<0.000000e+00> : vector<8x136xf32>
    %93 = tpu.matmul %92, %90, %cst_57 {dimension_numbers = #tpu.dot_dimension_numbers<[1], [0], [0], [1], [0, 0, 1, 1], [], []>} : vector<8x8xbf16>, vector<8x136xbf16>, vector<8x136xf32> -> vector<8x136xf32>
    %94 = arith.addf %89, %93 : vector<8x136xf32>
    %95 = vector.extract_strided_slice %78 {offsets = [0, 3], sizes = [8, 136], strides = [1, 1]} : vector<8x140xbf16> to vector<8x136xbf16>
    %c0_58 = arith.constant 0 : index
    %c3 = arith.constant 3 : index
    %c0_59 = arith.constant 0 : index
    %c0_60 = arith.constant 0 : index
    %96 = vector.load %arg5[%c0_58, %c3, %c0_59, %c0_60] : memref<2x5x8x8xbf16, #tpu.memory_space<vmem>>, vector<1x1x8x8xbf16>
    %97 = vector.shape_cast %96 : vector<1x1x8x8xbf16> to vector<8x8xbf16>
    %cst_61 = arith.constant dense<0.000000e+00> : vector<8x136xf32>
    %98 = tpu.matmul %97, %95, %cst_61 {dimension_numbers = #tpu.dot_dimension_numbers<[1], [0], [0], [1], [0, 0, 1, 1], [], []>} : vector<8x8xbf16>, vector<8x136xbf16>, vector<8x136xf32> -> vector<8x136xf32>
    %99 = arith.addf %94, %98 : vector<8x136xf32>
    %100 = vector.extract_strided_slice %78 {offsets = [0, 4], sizes = [8, 136], strides = [1, 1]} : vector<8x140xbf16> to vector<8x136xbf16>
    %c0_62 = arith.constant 0 : index
    %c4 = arith.constant 4 : index
    %c0_63 = arith.constant 0 : index
    %c0_64 = arith.constant 0 : index
    %101 = vector.load %arg5[%c0_62, %c4, %c0_63, %c0_64] : memref<2x5x8x8xbf16, #tpu.memory_space<vmem>>, vector<1x1x8x8xbf16>
    %102 = vector.shape_cast %101 : vector<1x1x8x8xbf16> to vector<8x8xbf16>
    %cst_65 = arith.constant dense<0.000000e+00> : vector<8x136xf32>
    %103 = tpu.matmul %102, %100, %cst_65 {dimension_numbers = #tpu.dot_dimension_numbers<[1], [0], [0], [1], [0, 0, 1, 1], [], []>} : vector<8x8xbf16>, vector<8x136xbf16>, vector<8x136xf32> -> vector<8x136xf32>
    %104 = arith.addf %99, %103 : vector<8x136xf32>
    %c0_66 = arith.constant 0 : index
    %c2_67 = arith.constant 2 : index
    %105 = vector.load %arg3[%c0_66, %c2_67] : memref<8x4xf32, #tpu.memory_space<vmem>>, vector<8x1xf32>
    %106 = vector.extract_strided_slice %11 {offsets = [0, 2], sizes = [1, 136], strides = [1, 1]} : vector<1x140xi1> to vector<1x136xi1>
    %107 = vector.broadcast %105 : vector<8x1xf32> to vector<8x136xf32>
    %108 = arith.addf %104, %107 : vector<8x136xf32>
    %cst_68 = arith.constant 0.000000e+00 : f32
    %109 = vector.shape_cast %106 : vector<1x136xi1> to vector<1x136xi1>
    %110 = vector.broadcast %109 : vector<1x136xi1> to vector<8x136xi1>
    %111 = vector.broadcast %cst_68 : f32 to vector<8x136xf32>
    %112 = arith.select %110, %108, %111 : vector<8x136xi1>, vector<8x136xf32>
    %113 = vector.extract_strided_slice %1 {offsets = [0, 2], sizes = [8, 136], strides = [1, 1]} : vector<8x140xf32> to vector<8x136xf32>
    %114 = arith.addf %113, %112 : vector<8x136xf32>
    %cst_69 = arith.constant 1.000000e-01 : f32
    %115 = vector.broadcast %cst_69 : f32 to vector<8x136xf32>
    %116 = arith.mulf %115, %114 : vector<8x136xf32>
    %117 = arith.maximumf %114, %116 : vector<8x136xf32>
    %118 = arith.truncf %117 : vector<8x136xf32> to vector<8x136xbf16>
    %cst_70 = arith.constant 0.000000e+00 : f32
    %119 = vector.broadcast %cst_70 : f32 to vector<8x128xf32>
    %120 = vector.extract_strided_slice %118 {offsets = [0, 0], sizes = [8, 128], strides = [1, 1]} : vector<8x136xbf16> to vector<8x128xbf16>
    %c1_71 = arith.constant 1 : index
    %c0_72 = arith.constant 0 : index
    %c0_73 = arith.constant 0 : index
    %c0_74 = arith.constant 0 : index
    %121 = vector.load %arg5[%c1_71, %c0_72, %c0_73, %c0_74] : memref<2x5x8x8xbf16, #tpu.memory_space<vmem>>, vector<1x1x8x8xbf16>
    %122 = vector.shape_cast %121 : vector<1x1x8x8xbf16> to vector<8x8xbf16>
    %cst_75 = arith.constant dense<0.000000e+00> : vector<8x128xf32>
    %123 = tpu.matmul %122, %120, %cst_75 {dimension_numbers = #tpu.dot_dimension_numbers<[1], [0], [0], [1], [0, 0, 1, 1], [], []>} : vector<8x8xbf16>, vector<8x128xbf16>, vector<8x128xf32> -> vector<8x128xf32>
    %124 = arith.addf %119, %123 : vector<8x128xf32>
    %125 = vector.extract_strided_slice %118 {offsets = [0, 2], sizes = [8, 128], strides = [1, 1]} : vector<8x136xbf16> to vector<8x128xbf16>
    %c1_76 = arith.constant 1 : index
    %c1_77 = arith.constant 1 : index
    %c0_78 = arith.constant 0 : index
    %c0_79 = arith.constant 0 : index
    %126 = vector.load %arg5[%c1_76, %c1_77, %c0_78, %c0_79] : memref<2x5x8x8xbf16, #tpu.memory_space<vmem>>, vector<1x1x8x8xbf16>
    %127 = vector.shape_cast %126 : vector<1x1x8x8xbf16> to vector<8x8xbf16>
    %cst_80 = arith.constant dense<0.000000e+00> : vector<8x128xf32>
    %128 = tpu.matmul %127, %125, %cst_80 {dimension_numbers = #tpu.dot_dimension_numbers<[1], [0], [0], [1], [0, 0, 1, 1], [], []>} : vector<8x8xbf16>, vector<8x128xbf16>, vector<8x128xf32> -> vector<8x128xf32>
    %129 = arith.addf %124, %128 : vector<8x128xf32>
    %130 = vector.extract_strided_slice %118 {offsets = [0, 4], sizes = [8, 128], strides = [1, 1]} : vector<8x136xbf16> to vector<8x128xbf16>
    %c1_81 = arith.constant 1 : index
    %c2_82 = arith.constant 2 : index
    %c0_83 = arith.constant 0 : index
    %c0_84 = arith.constant 0 : index
    %131 = vector.load %arg5[%c1_81, %c2_82, %c0_83, %c0_84] : memref<2x5x8x8xbf16, #tpu.memory_space<vmem>>, vector<1x1x8x8xbf16>
    %132 = vector.shape_cast %131 : vector<1x1x8x8xbf16> to vector<8x8xbf16>
    %cst_85 = arith.constant dense<0.000000e+00> : vector<8x128xf32>
    %133 = tpu.matmul %132, %130, %cst_85 {dimension_numbers = #tpu.dot_dimension_numbers<[1], [0], [0], [1], [0, 0, 1, 1], [], []>} : vector<8x8xbf16>, vector<8x128xbf16>, vector<8x128xf32> -> vector<8x128xf32>
    %134 = arith.addf %129, %133 : vector<8x128xf32>
    %135 = vector.extract_strided_slice %118 {offsets = [0, 6], sizes = [8, 128], strides = [1, 1]} : vector<8x136xbf16> to vector<8x128xbf16>
    %c1_86 = arith.constant 1 : index
    %c3_87 = arith.constant 3 : index
    %c0_88 = arith.constant 0 : index
    %c0_89 = arith.constant 0 : index
    %136 = vector.load %arg5[%c1_86, %c3_87, %c0_88, %c0_89] : memref<2x5x8x8xbf16, #tpu.memory_space<vmem>>, vector<1x1x8x8xbf16>
    %137 = vector.shape_cast %136 : vector<1x1x8x8xbf16> to vector<8x8xbf16>
    %cst_90 = arith.constant dense<0.000000e+00> : vector<8x128xf32>
    %138 = tpu.matmul %137, %135, %cst_90 {dimension_numbers = #tpu.dot_dimension_numbers<[1], [0], [0], [1], [0, 0, 1, 1], [], []>} : vector<8x8xbf16>, vector<8x128xbf16>, vector<8x128xf32> -> vector<8x128xf32>
    %139 = arith.addf %134, %138 : vector<8x128xf32>
    %140 = vector.extract_strided_slice %118 {offsets = [0, 8], sizes = [8, 128], strides = [1, 1]} : vector<8x136xbf16> to vector<8x128xbf16>
    %c1_91 = arith.constant 1 : index
    %c4_92 = arith.constant 4 : index
    %c0_93 = arith.constant 0 : index
    %c0_94 = arith.constant 0 : index
    %141 = vector.load %arg5[%c1_91, %c4_92, %c0_93, %c0_94] : memref<2x5x8x8xbf16, #tpu.memory_space<vmem>>, vector<1x1x8x8xbf16>
    %142 = vector.shape_cast %141 : vector<1x1x8x8xbf16> to vector<8x8xbf16>
    %cst_95 = arith.constant dense<0.000000e+00> : vector<8x128xf32>
    %143 = tpu.matmul %142, %140, %cst_95 {dimension_numbers = #tpu.dot_dimension_numbers<[1], [0], [0], [1], [0, 0, 1, 1], [], []>} : vector<8x8xbf16>, vector<8x128xbf16>, vector<8x128xf32> -> vector<8x128xf32>
    %144 = arith.addf %139, %143 : vector<8x128xf32>
    %c0_96 = arith.constant 0 : index
    %c3_97 = arith.constant 3 : index
    %145 = vector.load %arg3[%c0_96, %c3_97] : memref<8x4xf32, #tpu.memory_space<vmem>>, vector<8x1xf32>
    %146 = vector.extract_strided_slice %11 {offsets = [0, 6], sizes = [1, 128], strides = [1, 1]} : vector<1x140xi1> to vector<1x128xi1>
    %147 = vector.broadcast %145 : vector<8x1xf32> to vector<8x128xf32>
    %148 = arith.addf %144, %147 : vector<8x128xf32>
    %cst_98 = arith.constant 0.000000e+00 : f32
    %149 = vector.shape_cast %146 : vector<1x128xi1> to vector<1x128xi1>
    %150 = vector.broadcast %149 : vector<1x128xi1> to vector<8x128xi1>
    %151 = vector.broadcast %cst_98 : f32 to vector<8x128xf32>
    %152 = arith.select %150, %148, %151 : vector<8x128xi1>, vector<8x128xf32>
    %153 = vector.extract_strided_slice %114 {offsets = [0, 4], sizes = [8, 128], strides = [1, 1]} : vector<8x136xf32> to vector<8x128xf32>
    %154 = arith.addf %153, %152 : vector<8x128xf32>
    %155 = arith.addf %74, %154 : vector<8x128xf32>
    %cst_99 = arith.constant 5.000000e-01 : f32
    %156 = vector.broadcast %cst_99 : f32 to vector<8x128xf32>
    %157 = arith.mulf %155, %156 : vector<8x128xf32>
    %c0_100 = arith.constant 0 : index
    %c0_101 = arith.constant 0 : index
    %c0_102 = arith.constant 0 : index
    %158 = vector.load %arg6[%c0_100, %c0_101, %c0_102] : memref<1x8x128xf32, #tpu.memory_space<vmem>>, vector<1x8x128xf32>
    %159 = vector.shape_cast %158 : vector<1x8x128xf32> to vector<8x128xf32>
    %160 = vector.shape_cast %157 : vector<8x128xf32> to vector<1x8x128xf32>
    tpu.vector_store %arg6[%c0_100, %c0_101, %c0_102], %160 {strides = array<i32>} : memref<1x8x128xf32, #tpu.memory_space<vmem>>, vector<1x8x128xf32>,
    return
  }
  func.func @transform_0(%arg0: i32, %arg1: i32) -> (i32, i32, i32, i32) {
    %c0_i32 = arith.constant 0 : i32
    %c0_i32_0 = arith.constant 0 : i32
    %c0_i32_1 = arith.constant 0 : i32
    return %arg0, %arg1, %c0_i32, %c0_i32_0 : i32, i32, i32, i32
  }
  func.func @transform_1(%arg0: i32, %arg1: i32) -> (i32, i32) {
    %c0_i32 = arith.constant 0 : i32
    %c0_i32_0 = arith.constant 0 : i32
    %c0_i32_1 = arith.constant 0 : i32
    return %c0_i32, %c0_i32_0 : i32, i32
  }
  func.func @transform_2(%arg0: i32, %arg1: i32) -> (i32, i32, i32, i32) {
    %c0_i32 = arith.constant 0 : i32
    %c0_i32_0 = arith.constant 0 : i32
    %c0_i32_1 = arith.constant 0 : i32
    %c0_i32_2 = arith.constant 0 : i32
    %c0_i32_3 = arith.constant 0 : i32
    return %c0_i32, %c0_i32_0, %c0_i32_1, %c0_i32_2 : i32, i32, i32, i32
  }
  func.func @transform_3(%arg0: i32, %arg1: i32) -> (i32, i32, i32, i32) {
    %c0_i32 = arith.constant 0 : i32
    %c0_i32_0 = arith.constant 0 : i32
    %c0_i32_1 = arith.constant 0 : i32
    %c0_i32_2 = arith.constant 0 : i32
    %c0_i32_3 = arith.constant 0 : i32
    return %c0_i32, %c0_i32_0, %c0_i32_1, %c0_i32_2 : i32, i32, i32, i32
  }
  func.func @transform_4(%arg0: i32, %arg1: i32) -> (i32, i32, i32) {
    %c0_i32 = arith.constant 0 : i32
    %c0_i32_0 = arith.constant 0 : i32
    return %arg0, %c0_i32, %arg1 : i32, i32, i32
  }
}

</mosaic_0001>

<bundles_post_ra>
// kernel: tpu_custom_call.1
= control target key start
LH: loop header
LB: loop body
LE: loop exit
PB: predicated region body
PF: predicated region fallthrough
CT: control target
= control target key end

     0   :  { %s2248_s0 = inlined_call_operand.hbm [shape: f32[2,2,8,140], index: 0, kind: input, shape index: {}]   ;;  %s2249_s1 = inlined_call_operand.vmem [shape: f32[8,4], index: 1, kind: input, shape index: {}]   ;;  %s2250_s2 = inlined_call_operand.hbm [shape: bf16[2,3,8,8], index: 2, kind: input, shape index: {}]   ;;  %s2251_s3 = inlined_call_operand.hbm [shape: bf16[2,5,8,8], index: 3, kind: input, shape index: {}]   ;;  %s2252_s4 = inlined_call_operand.hbm [shape: f32[2,8,256], index: 4, kind: output, shape index: {}]  }
   0x1   :  { %2262 = sst [smem:[#allocation16_spill]] %s2250_s2 }
   0x2   :  { %2263 = sst [smem:[#allocation17_spill]] %s2251_s3 }
   0x3   :  { %2264 = sst [smem:[#allocation18_spill]] %s2252_s4 }
   0x4   :  { %9 = vsyncpa [#allocation3], 0 }
   0x5   :  { %11 = vsyncpa [#allocation3 + $0x1], 0 }
   0x6   :  { %12 = vsyncpa [#allocation6], 0 }
   0x7   :  { %13 = vsyncpa [#allocation4], 0 }
   0x8   :  { %15 = vsyncpa [#allocation4 + $0x1], 0  ;;  %s1837_s15 = smov 0   ;;  %s1839_s16 = smov 0  }
   0x9   :  { %s1841_s17 = smov 0   ;;  %s1843_s18 = smov 0  }
   0xa   :  { %s1845_s19 = smov 0   ;;  %s1847_s20 = smov 0  }
   0xb   :  { %s1849_s21 = smov 0   ;;  %s1851_s22 = smov 0  }
   0xc LB: > { %2265 = sst [smem:[#allocation12_spill]] %s1758_s15  ;;  %s1393_s23 = sadd.s32 4294967295, %s1786_s22   ;;  %s1786_s22 = sphi %s1851_s22, %s21_s22   ;;  %s1782_s21 = sphi %s1849_s21, %s2298_s21   ;;  %s1778_s20 = sphi %s1847_s20, %s2297_s20   ;;  %s1774_s19 = sphi %s1845_s19, %s2296_s19   ;;  %s1770_s18 = sphi %s1843_s18, %s2295_s18   ;;  %s1766_s17 = sphi %s1841_s17, %s2294_s17   ;;  %s1762_s16 = sphi %s1839_s16, %s2293_s16   ;;  %s1758_s15 = sphi %s1837_s15, %s2292_s15  }
   0xd   : > { %s1394_s24 = sadd.s32 4294967294, %s1786_s22   ;;  %p55_p0 = scmp.ne.s32.totalorder %s1762_s16, %s1758_s15 }
   0xe   : > { %p1881_p1 = scmp.eq.s32.totalorder %s1393_s23, 0  ;;  %p1885_p2 = scmp.eq.s32.totalorder %s1393_s23, 3 }
   0xf   : > { %p150_p3 = scmp.eq.s32.totalorder %s1394_s24, 3  ;;  %p1395_p5 = scmp.ge.s32.totalorder %s1786_s22, 1 }
  0x10   : > { %s2266_s25 = scalar_select %p1881_p1, 1, 0 }
  0x11   : > { %p1891_p4 = por %p1881_p1, %p55_p0  ;;  %p1896_p6 = por %p150_p3, %p55_p0 }
  0x12   : > { %p157_p7 = scmp.lt.s32.totalorder %s1786_s22, 5  ;;  %s1788_s30 = smov [#allocation5]  }
  0x13   : > { %s2268_s27 = scalar_select %p1891_p4, 1, 0 }
  0x14   : > { %s2269_s28 = scalar_select %p1896_p6, 1, 0 }
  0x15   : > { %p1901_p8 = pnand %p1395_p5, %p157_p7  ;;  %s172_s5 = sshll.u32 %s1788_s30, 4  ;;  %s173_s5 = int_to_ptr.vmem [resolvable:$true] %s172_s5 }
  0x16   : > { %2270 = sst [smem:[#allocation13_spill]] %s2269_s28  ;;  %s1789_s7 = smov [#allocation7]  }
  0x17   : > { %p1494_p9 = pneg %p1901_p8  ;;  %s185_s8 = sshll.u32 %s1789_s7, 4  ;;  %s186_s8 = int_to_ptr.vmem [resolvable:$true] %s185_s8 }
  0x18   : > { %s1617_s9 = scalar_lea.vmem %s173_s5, 384  ;;  %p1625_p3 = scmp.lt.s32.totalorder %s173_s5, %s173_s5 }
  0x19   : > { %p1909_p10 = pnand %p1494_p9, %p1881_p1  ;;  %p1618_p12 = scmp.ne.s32.totalorder %s173_s5, %s1617_s9 }
  0x1a   : > { %p1626_p5 = scmp.lt.s32.totalorder %s1617_s9, %s1617_s9 }
  0x1b   : > { %p1608_p11 = pneg %p1909_p10 }
  0x1c   : > { %p1627_p7 = por %p1626_p5, %p1625_p3 }
  0x1d   : > { %p1620_p13 = pnand %p1618_p12, %p1608_p11 }
  0x1f   : > { %p1621_p0 = pneg %p1620_p13 }
  0x21   : > { %p1628_p9 = pnand %p1627_p7, %p1621_p0 }
  0x23   : > { %1631 = shalt.err (!%p1628_p9)
}
  0x24   : > { %s1790_s10 = smov 64   ;;  %s1791_s11 = smov 4  }
  0x25   : > { %s2273_s2 = sld [smem:[#allocation16_spill]]  ;;  %s1643_s14 = scalar_lea.vmem %s186_s8, 640 }
  0x26   : > { %p1644_p6 = scmp.ne.s32.totalorder %s186_s8, %s1643_s14  ;;  %p1651_p1 = scmp.lt.s32.totalorder %s186_s8, %s186_s8 }
  0x27   : > { %p1652_p4 = scmp.lt.s32.totalorder %s1643_s14, %s1643_s14 }
  0x28   : > { %p1646_p12 = pnand %p1644_p6, %p1608_p11 }
  0x29   : > { %p1653_p3 = por %p1652_p4, %p1651_p1 }
  0x2a   : > { %p1647_p13 = pneg %p1646_p12 }
  0x2b   : > { %1497 = dma.hbm_to_vmem [thread:$0]  (!%p1909_p10), %s2273_s2, 384, %s173_s5, [#allocation6], %s1790_s10, %s1790_s10, %s1791_s11  }
  0x2c   : > { %p1654_p0 = pnand %p1653_p3, %p1647_p13 }
  0x2e   : > { %1657 = shalt.err (!%p1654_p0)
}
  0x2f   : > { %s2274_s3 = sld [smem:[#allocation17_spill]]  ;;  %s30_s30 = sadd.s32 1, %s1778_s20 }
  0x30   : > { %s33_s5 = sadd.s32 1, %s1782_s21  ;;  %p31_p1 = scmp.ge.s32.totalorder %s30_s30, 2 }
  0x31   : > { %s42_s6 = sadd.s32 1, %s1766_s17  ;;  %p49_p4 = scmp.ne.s32.totalorder %s1766_s17, %s1762_s16 }
  0x32   : > { %p50_p6 = scmp.eq.s32.totalorder %s1786_s22, 0  ;;  %s2300_s30 = smov (%p31_p1, %s30_s30), 0 }
  0x33   : > { %2275 = sst [smem:[#allocation14_spill]] %s2300_s30  ;;  %s2302_s5 = smov (!%p31_p1, %s33_s5), %s1782_s21 }
  0x34   : > { %s38_s7 = ssub.s32 %s1778_s20, %s2300_s30  ;;  %p1942_p11 = por %p50_p6, %p49_p4 }
  0x35   : > { %1500 = dma.hbm_to_vmem [thread:$0]  (!%p1909_p10), %s2274_s3, 640, %s186_s8, [#allocation6], %s1790_s10, %s1790_s10, %s1791_s11  }
  0x36   : > { %p35_p10 = scmp.ge.s32.totalorder %s2302_s5, 2  ;;  %p1948_p5 = por %p1885_p2, %p49_p4 }
  0x37   : > { %p1511_p7 = scmp.lt.s32.totalorder %s1786_s22, 4  ;;  %s199_s10 = sand.u32 1, %s1766_s17  }
  0x38   : > { %s2277_s8 = scalar_select %p1948_p5, 1, 0 }
  0x39   : > { %s2304_s5 = smov (%p35_p10, %s2302_s5), 0  ;;  %s1399_s11 = sshll.u32 %s199_s10, 4 }
  0x3a   : > { %2278 = sst [smem:[#allocation15_spill]] %s2277_s8  ;;  %s37_s12 = ssub.s32 %s1782_s21, %s2304_s5 }
  0x3b   : > { %s39_s13 = sor.u32 %s38_s7, %s37_s12  ;;  %s1400_s14 = sshll.u32 %s1778_s20, 1 }
  0x3c   : > { %p40_p9 = scmp.eq.s32.totalorder %s39_s13, 0  ;;  %s1401_s23 = sshll.u32 %s1782_s21, 2 }
  0x3d   : > { %s209_s24 = sadd.s32 %s1401_s23, %s1400_s14  ;;  %s203_s2 = scalar_lea.vmem [#allocation2], %s1399_s11 }
  0x3e   : > { %s213_s26 = sshll.u32 %s203_s2, 4  ;;  %s1402_s30 = sshll.u32 %s209_s24, 7  ;;  %s214_s26 = int_to_ptr.vmem [resolvable:$true] %s213_s26 }
  0x3f   : > { %s1961_s3 = scalar_select %p40_p9, %s1766_s17, %s42_s6  }
  0x40   : > { %s211_s4 = scalar_lea.hbm %s2248_s0, %s1402_s30  ;;  %p1970_p2 = pnand %p1511_p7, %p1942_p11 }
  0x41   : > { %s200_s7 = scalar_lea.sflag [#allocation3], %s199_s10  ;;  %s1671_s11 = scalar_lea.vmem %s214_s26, 256 }
  0x42   : > { %p1660_p12 = pneg %p1970_p2  ;;  %p1672_p13 = scmp.ne.s32.totalorder %s214_s26, %s1671_s11 }
  0x43   : > { %s1792_s2 = smov [#allocation2]  }
  0x44   : > { %p1674_p3 = pnand %p1672_p13, %p1660_p12  ;;  %s1676_s6 = sshll.u32 %s1792_s2, 4  ;;  %s1677_s6 = int_to_ptr.vmem [resolvable:$false] %s1676_s6 }
  0x45   : > { %s1678_s12 = scalar_lea.vmem %s1677_s6, 512  ;;  %p1679_p1 = scmp.lt.s32.totalorder %s214_s26, %s1677_s6 }
  0x46   : > { %p1675_p0 = pneg %p1674_p3  ;;  %p1680_p4 = scmp.lt.s32.totalorder %s1678_s12, %s1671_s11 }
  0x48   : > { %p1681_p6 = por %p1680_p4, %p1679_p1 }
  0x4a   : > { %p1682_p10 = pnand %p1681_p6, %p1675_p0 }
  0x4c   : > { %1685 = shalt.err (!%p1682_p10)
}
  0x4d   : > { %1504 = dma.hbm_to_vmem [thread:$0]  (!%p1970_p2), %s211_s4, 256, %s214_s26, %s200_s7  }
  0x4e   : > { %222 = sbr.rel (%p1901_p8) target bundleno = 1610 (0x64a), region = 36  ;;  %s1981_s15 = sand.u32 (!%p1901_p8), 1, %s1762_s16  }
  0x4f   : > { %s1404_s28 = sshll.u32 (!%p1901_p8), %s1981_s15, 4  ;;  %s225_s30 = scalar_lea.sflag (!%p1901_p8), [#allocation3], %s1981_s15 }
  0x50   : > { %s228_s9 = scalar_lea.vmem (!%p1901_p8), [#allocation2], %s1404_s28  ;;  %p2280_p11 = scmp.ne.s32.totalorder (!%p1901_p8), %s2268_s27, 0 }
  0x53   : > { %1745 = dma.done.wait (%p2280_p11), %s225_s30, 256  }
  0x54   : > { %1747 = vsyncadd (%p2280_p11), %s225_s30, 4294967040  ;;  %p2281_p7 = scmp.ne.s32.totalorder %s2266_s25, 0 }
  0x56   : > { %1749 = dma.done.wait (%p2281_p7), [#allocation6], 1024  }
  0x57   : > { %1751 = vsyncadd (%p2281_p7), [#allocation6], 4294966272  ;;  %v1993_v0 = vld [vmem:[%s228_s9] sm:$0xff]  ;;  %v1995_v1 = vld [vmem:[%s228_s9 + $0x8] sm:$0xff]  ;;  %v1793_v4 = vmov 0   ;;  %vm299_vm0 = vcmask 1043456   ;;  %v264_v41 = vlaneseq }
  0x58   : > { %v278_v2 = vmul.f32 0.1, %v1993_v0  ;;  %v279_v3 = vmul.f32 0.1, %v1995_v1  ;;  %338 = vmatprep.mubr.bf16.mxu0 %v1793_v4  ;;  %388 = vmatprep.mubr.bf16.mxu1 %v1793_v4  ;;  %s1794_s4 = smov 127   ;;  %s1795_s25 = smov 126  }
  0x59   : > { %1601 = vset.pattern.permute.xlu0 %v1793_v4  ;;  %vm295_vm1 = vcmask 64512   ;;  %v284_v10 = vld [vmem:[#allocation5] sm:$0xf]  ;;  %vm293_vm2 = vcmask 1039360   ;;  %vm403_vm3 = vcmask 1031168   ;;  %s1796_s8 = smov 1  }
  0x5a   : > { %v280_v5 = vmax.f32 %v1993_v0, %v278_v2  ;;  %v281_v6 = vmax.f32 %v1995_v1, %v279_v3  ;;  %v2027_v11 = vld [vmem:[%s2249_s1] sm:$0xff]  ;;  %v398_v21 = vld [vmem:[#allocation5 + $0x8] sm:$0xf]  ;;  %s1408_s10 = sshll.u32 %s1770_s18, 7  ;;  %v265_v42 = vand.u32 127, %v264_v41  ;;  %vm475_vm9 = vcmask 7168  }
  0x5b   : > { %v286_v19 = vld [vmem:[#allocation5 + $0x4] sm:$0xf]  ;;  %s1409_s13 = sadd.s32 4294967290, %s1408_s10  ;;  %s1797_s14 = smov 125   ;;  %v1800_v62 = vmov 2   ;;  %vm499_vm11 = vcmask 1022976  }
  0x5c   : > { %v2004_v7 = vpack.c.bf16 %v280_v5, %v280_v5  ;;  %v2006_v8 = vpack.c.bf16 %v281_v6, %v281_v6  ;;  %v269_v43 = vstv %s1409_s13  ;;  %v266_v45 = vadd.s32 128, %v265_v42  ;;  %s1798_s23 = smov 123   ;;  %s1799_s24 = smov 124  }
  0x5d   : > { %v270_v44 = vadd.s32 %v269_v43, %v265_v42  ;;  %vm612_vm12 = vcmask 1006592   ;;  %vm892_vm13 = vcmask 1014784   ;;  %s1801_s26 = smov 2   ;;  %vm958_vm14 = vcmask 15360   ;;  %s1806_s7 = smov 122  }
  0x5e   : > { %289 = vrot.lane.b32.xlu0 %v2004_v7, %s1794_s4  ;;  %399 = vrot.lane.b32.xlu1 %v2004_v7, %s1795_s25  ;;  %v2014_v9 = vsel %vm299_vm0, %v2004_v7, 0  ;;  %v271_v46 = vadd.s32 %v269_v43, %v266_v45  ;;  %vm1804_vm15 = vmmov 0   ;;  %s1807_s11 = smov 120   ;;  %s1808_s2 = smov 118  }
  0x5f   : > { %1412 = vmatprep.subr.msk.bf16.mxu1 %vm299_vm0, %v2006_v8  ;;  %vm272_vm4 = vcmp.ge.s32.totalorder %v270_v44, 0  ;;  %vm274_vm5 = vcmp.lt.s32.totalorder %v270_v44, 256  ;;  %s1809_s6 = smov 3   ;;  %s1810_s12 = smov 6  }
  0x60   : > { %371 = vmatpush1.bf16.msra.mxu1 %v2014_v9  ;;  %vm2056_vm6 = vmand %vm272_vm4, %vm274_vm5  ;;  %vm273_vm7 = vcmp.ge.s32.totalorder %v271_v46, 0  ;;  %vm275_vm8 = vcmp.lt.s32.totalorder %v271_v46, 256  ;;  %vm1196_vm4 = vcmask 965632   ;;  %s1407_s30 = sshll.u32 %s1981_s15, 3  ;;  %s1438_s9 = sshll.u32 %s1774_s19, 1 }
  0x61   : > { %vm2065_vm10 = vmand %vm273_vm7, %vm275_vm8  ;;  %s260_s27 = scalar_lea.vmem [#allocation8], %s1407_s30  ;;  %s2287_s13 = sld [smem:[#allocation18_spill]] }
  0x62   : > { %291 = vrot.lane.b32.xlu0 %v2006_v8, %s1794_s4  ;;  %401 = vrot.lane.b32.xlu1 %v2006_v8, %s1795_s25  ;;  %s1288_s29 = sshll.u32 %s260_s27, 4  ;;  %s1289_s29 = int_to_ptr.vmem [resolvable:$true] %s1288_s29 }
  0x63   : > { %1413 = vmatmul.mubr.msk.bf16.vlgmr.msra.gmra.mxu1 %vm295_vm1, %v284_v10 }
  0x64   : > { %542 = vmatprep.mubr.bf16.mxu1 %v1793_v4 }
  0x66   : > { %460 = vperm.xlu0 %1601, %v2027_v11  }
  0x6a   : > { %1602 = vset.pattern.permute.xlu0 %v1800_v62 }
  0xd0   : > { %v290_v12 = vpop.permute.xlu0 %289  ;;  %v400_v13 = vpop.permute.xlu1 %399 }
  0xd4   : > { %v2031_v14 = vpop.permute.xlu0 %291  ;;  %v2033_v15 = vpop.permute.xlu1 %401 }
  0xd5   : > { %1410 = vmatprep.subr.msk.bf16.mxu0 %vm299_vm0, %v2031_v14  ;;  %v294_v16 = vsel %vm293_vm2, %v290_v12, %v2031_v14  ;;  %v404_v17 = vsel %vm403_vm3, %v400_v13, %v2033_v15 }
  0xd6   : > { %v2042_v18 = vsel %vm299_vm0, %v294_v16, 0  ;;  %v2048_v20 = vsel %vm299_vm0, %v404_v17, 0  ;;  %v490_v16 = vld [vmem:[#allocation5 + $0xc] sm:$0xf] }
  0xd7   : > { %321 = vmatpush1.bf16.msra.mxu0 %v2042_v18 }
  0xd8   : > { %1414 = vmatprep.subr.msk.bf16.mxu0 %vm299_vm0, %v2033_v15 }
  0xda   : > { %1411 = vmatmul.mubr.msk.bf16.vlgmr.msra.gmra.mxu0 %vm295_vm1, %v286_v19 }
  0xdb   : > { %429 = vmatpush1.bf16.msra.mxu0 %v2048_v20  ;;  %446 = vmatprep.mubr.bf16.mxu0 %v1793_v4 }
  0xe1   : > { %v461_v32 = vpop.permute.xlu0 %460 }
  0xe2   : > { %1415 = vmatmul.mubr.msk.bf16.vlgmr.msra.gmra.mxu0 %vm295_vm1, %v398_v21 }
  0xe3   : > { %597 = vmatprep.mubr.bf16.mxu0 %v1793_v4 }
 0x123   : > { %v390_v22 = vpop.f32.mrf.mxu1 }
 0x125   : > { %v392_v23 = vpop.f32.mrf.mxu1 }
 0x127   : > { %v394_v24 = vpop.f32.mrf.mxu1 }
 0x129   : > { %v395_v25 = vpop.f32.mrf.mxu1 }
 0x19a   : > { %v340_v26 = vpop.f32.mrf.mxu0 }
 0x19b   : > { %v391_v30 = vadd.f32 %v390_v22, %v340_v26 }
 0x19c   : > { %v342_v27 = vpop.f32.mrf.mxu0 }
 0x19d   : > { %v393_v33 = vadd.f32 %v392_v23, %v342_v27  ;;  %v607_v23 = vld [vmem:[#allocation5 + $0x14] sm:$0xf]  ;;  %v688_v27 = vld [vmem:[#allocation7] sm:$0xf] }
 0x19e   : > { %v344_v28 = vpop.f32.mrf.mxu0 }
 0x19f   : > { %v780_v28 = vld [vmem:[#allocation7 + $0x8] sm:$0xf] }
 0x1a0   : > { %v345_v29 = vpop.f32.mrf.mxu0 }
 0x1a2   : > { %v448_v31 = vpop.f32.mrf.mxu0 }
 0x1a3   : > { %v455_v34 = vadd.f32 %v448_v31, %v391_v30  ;;  %v887_v30 = vld [vmem:[#allocation7 + $0x10] sm:$0xf] }
 0x1a4   : > { %v450_v35 = vpop.f32.mrf.mxu0 }
 0x1a5   : > { %v456_v36 = vadd.f32 %v450_v35, %v393_v33  ;;  %v463_v37 = vadd.f32 %v461_v32, %v455_v34 }
 0x1a6   : > { %v452_v38 = vpop.f32.mrf.mxu0 }
 0x1a7   : > { %471 = vrot.lane.b32.xlu1 %v463_v37, %s1796_s8  ;;  %v464_v40 = vadd.f32 %v461_v32, %v456_v36 }
 0x1a8   : > { %v453_v39 = vpop.f32.mrf.mxu0 }
 0x1ab   : > { %473 = vrot.lane.b32.xlu1 %v464_v40, %s1796_s8 }
 0x219   : > { %v472_v48 = vpop.permute.xlu1 %471 }
 0x21a   : > { %v479_v49 = vsel %vm2056_vm6, %v472_v48, 0.0 }
 0x21b   : > { %v2063_v50 = vadd.f32 %v479_v49, %v1993_v0 }
 0x21d   : > { %v474_v52 = vpop.permute.xlu1 %473  ;;  %v483_v53 = vmul.f32 0.1, %v2063_v50 }
 0x21e   : > { %v476_v54 = vsel %vm475_vm9, %v472_v48, %v474_v52 }
 0x21f   : > { %v480_v55 = vsel %vm2065_vm10, %v476_v54, 0.0  ;;  %v485_v56 = vmax.f32 %v2063_v50, %v483_v53 }
 0x220   : > { %v2074_v57 = vadd.f32 %v480_v55, %v1995_v1 }
 0x221   : > { %v487_v58 = vpack.c.bf16 %v485_v56, %v485_v56 }
 0x222   : > { %v484_v59 = vmul.f32 0.1, %v2074_v57 }
 0x223   : > { %495 = vrot.lane.b32.xlu0 %v487_v58, %s1797_s14 }
 0x224   : > { %v486_v60 = vmax.f32 %v2074_v57, %v484_v59 }
 0x226   : > { %v488_v61 = vpack.c.bf16 %v486_v60, %v486_v60 }
 0x227   : > { %551 = vrot.lane.b32.xlu0 %v487_v58, %s1794_s4 }
 0x228   : > { %497 = vrot.lane.b32.xlu1 %v488_v61, %s1797_s14 }
 0x22b   : > { %608 = vrot.lane.b32.xlu0 %v487_v58, %s1798_s23 }
 0x22c   : > { %553 = vrot.lane.b32.xlu1 %v488_v61, %s1794_s4  ;;  %s1284_s4 = sadd.s32 %s1770_s18, %s1438_s9  ;;  %s1811_s18 = smov [#allocation8]  }
 0x22d   : > { %s1690_s19 = sshll.u32 %s1811_s18, 4  ;;  %s1691_s19 = int_to_ptr.vmem [resolvable:$false] %s1690_s19 }
 0x22e   : > { %p1693_p12 = scmp.lt.s32.totalorder %s1289_s29, %s1691_s19 }
 0x22f   : > { %829 = vrot.lane.b32.xlu0 %v2004_v7, %s1797_s14 }
 0x230   : > { %610 = vrot.lane.b32.xlu1 %v488_v61, %s1798_s23  ;;  %s1273_s23 = scalar_lea.sflag [#allocation4], %s1981_s15 }
 0x233   : > { %888 = vrot.lane.b32.xlu0 %v2004_v7, %s1799_s24  ;;  %v492_v7 = vld [vmem:[#allocation5 + $0x10] sm:$0xf] }
 0x234   : > { %831 = vrot.lane.b32.xlu1 %v2006_v8, %s1797_s14 }
 0x237   : > { %947 = vperm.xlu0 %1602, %v2027_v11  }
 0x238   : > { %890 = vrot.lane.b32.xlu1 %v2006_v8, %s1799_s24 }
 0x295   : > { %v496_v63 = vpop.permute.xlu0 %495 }
 0x299   : > { %v552_v5 = vpop.permute.xlu0 %551 }
 0x29a   : > { %v498_v2 = vpop.permute.xlu1 %497 }
 0x29b   : > { %v500_v3 = vsel %vm499_vm11, %v496_v63, %v498_v2  ;;  %1416 = vmatprep.subr.msk.bf16.mxu1 %vm299_vm0, %v498_v2 }
 0x29c   : > { %v505_v6 = vsel %vm299_vm0, %v500_v3, 0 }
 0x29d   : > { %525 = vmatpush1.bf16.msra.mxu1 %v505_v6  ;;  %v609_v17 = vpop.permute.xlu0 %608 }
 0x29e   : > { %v554_v10 = vpop.permute.xlu1 %553 }
 0x29f   : > { %v555_v12 = vsel %vm293_vm2, %v552_v5, %v554_v10  ;;  %1418 = vmatprep.subr.msk.bf16.mxu0 %vm299_vm0, %v554_v10  ;;  %vm1086_vm2 = vcmask 998400  }
 0x2a0   : > { %v560_v13 = vsel %vm299_vm0, %v555_v12, 0  ;;  %1417 = vmatmul.mubr.msk.bf16.vlgmr.msra.gmra.mxu1 %vm295_vm1, %v492_v7 }
 0x2a1   : > { %580 = vmatpush1.bf16.msra.mxu0 %v560_v13  ;;  %655 = vmatprep.mubr.bf16.mxu1 %v1793_v4  ;;  %v830_v24 = vpop.permute.xlu0 %829 }
 0x2a2   : > { %1422 = vmatprep.subr.msk.bf16.mxu0 %vm299_vm0, %v2031_v14  ;;  %v611_v19 = vpop.permute.xlu1 %610  ;;  %v690_v14 = vld [vmem:[#allocation7 + $0x4] sm:$0xf] }
 0x2a3   : > { %v613_v21 = vsel %vm612_vm12, %v609_v17, %v611_v19  ;;  %1420 = vmatprep.subr.msk.bf16.mxu1 %vm299_vm0, %v611_v19 }
 0x2a4   : > { %v618_v22 = vsel %vm299_vm0, %v613_v21, 0  ;;  %1419 = vmatmul.mubr.msk.bf16.vlgmr.msra.gmra.mxu0 %vm295_vm1, %v490_v16 }
 0x2a5   : > { %638 = vmatpush1.bf16.msra.mxu1 %v618_v22  ;;  %709 = vmatpush1.bf16.msra.mxu0 %v2042_v18 }
 0x2a6   : > { %1426 = vmatprep.subr.msk.bf16.mxu0 %vm299_vm0, %v2033_v15  ;;  %726 = vmatprep.mubr.bf16.mxu0 %v1793_v4  ;;  %v832_v25 = vpop.permute.xlu1 %831  ;;  %v889_v15 = vpop.permute.xlu0 %888 }
 0x2a7   : > { %1424 = vmatprep.subr.msk.bf16.mxu1 %vm299_vm0, %v2006_v8  ;;  %v833_v18 = vsel %vm499_vm11, %v830_v24, %v832_v25 }
 0x2a8   : > { %1421 = vmatmul.mubr.msk.bf16.vlgmr.msra.gmra.mxu1 %vm295_vm1, %v607_v23  ;;  %v838_v8 = vsel %vm299_vm0, %v833_v18, 0  ;;  %v1802_v18 = vmov 1  }
 0x2a9   : > { %753 = vmatpush1.bf16.msra.mxu1 %v2014_v9  ;;  %770 = vmatprep.mubr.bf16.mxu1 %v1793_v4 }
 0x2aa   : > { %1428 = vmatprep.subr.msk.bf16.mxu1 %vm299_vm0, %v832_v25  ;;  %v891_v26 = vpop.permute.xlu1 %890  ;;  %1603 = vset.pattern.permute.xlu0 %v1802_v18 }
 0x2ab   : > { %v893_v9 = vsel %vm892_vm13, %v889_v15, %v891_v26 }
 0x2ac   : > { %1423 = vmatmul.mubr.msk.bf16.vlgmr.msra.gmra.mxu0 %vm295_vm1, %v690_v14  ;;  %v898_v29 = vsel %vm299_vm0, %v893_v9, 0 }
 0x2ad   : > { %799 = vmatpush1.bf16.msra.mxu0 %v2048_v20  ;;  %816 = vmatprep.mubr.bf16.mxu0 %v1793_v4  ;;  %v828_v20 = vld [vmem:[#allocation7 + $0xc] sm:$0xf] }
 0x2ae   : > { %1430 = vmatprep.subr.msk.bf16.mxu0 %vm299_vm0, %v891_v26 }
 0x2b0   : > { %1425 = vmatmul.mubr.msk.bf16.vlgmr.msra.gmra.mxu1 %vm295_vm1, %v688_v27 }
 0x2b1   : > { %858 = vmatpush1.bf16.msra.mxu1 %v838_v8  ;;  %875 = vmatprep.mubr.bf16.mxu1 %v1793_v4 }
 0x2b2   : > { %v948_v10 = vpop.permute.xlu0 %947 }
 0x2b4   : > { %1427 = vmatmul.mubr.msk.bf16.vlgmr.msra.gmra.mxu0 %vm295_vm1, %v780_v28  ;;  %v1803_v28 = vmov 0.0  }
 0x2b5   : > { %918 = vmatpush1.bf16.msra.mxu0 %v898_v29  ;;  %935 = vmatprep.mubr.bf16.mxu0 %v1793_v4 }
 0x2b6   : > { %1452 = vmatprep.subr.bf16.mxu1 %v1803_v28  ;;  %1458 = vmatprep.subr.bf16.mxu0 %v1803_v28 }
 0x2b8   : > { %1429 = vmatmul.mubr.msk.bf16.vlgmr.msra.gmra.mxu1 %vm295_vm1, %v828_v20 }
 0x2b9   : > { %1454 = vmatprep.mubr.msk.bf16.mxu1 %vm1804_vm15, %v1803_v28 }
 0x2bc   : > { %1431 = vmatmul.mubr.msk.bf16.vlgmr.msra.gmra.mxu0 %vm295_vm1, %v887_v30 }
 0x2bd   : > { %1460 = vmatprep.mubr.msk.bf16.mxu0 %vm1804_vm15, %v1803_v28 }
 0x360   : > { %v544_v31 = vpop.f32.mrf.mxu1 }
 0x362   : > { %v546_v32 = vpop.f32.mrf.mxu1 }
 0x364   : > { %v548_v33 = vpop.f32.mrf.mxu1  ;;  %v599_v34 = vpop.f32.mrf.mxu0 }
 0x365   : > { %v600_v35 = vadd.f32 %v599_v34, %v544_v31 }
 0x366   : > { %v549_v36 = vpop.f32.mrf.mxu1  ;;  %v601_v37 = vpop.f32.mrf.mxu0 }
 0x367   : > { %v602_v38 = vadd.f32 %v601_v37, %v546_v32 }
 0x368   : > { %v603_v39 = vpop.f32.mrf.mxu0  ;;  %v657_v40 = vpop.f32.mrf.mxu1 }
 0x369   : > { %v2124_v41 = vadd.f32 %v657_v40, %v600_v35  ;;  %v975_v40 = vld [vmem:[#allocation7 + $0x18] sm:$0xf] }
 0x36a   : > { %v604_v42 = vpop.f32.mrf.mxu0  ;;  %v659_v43 = vpop.f32.mrf.mxu1 }
 0x36b   : > { %v2126_v4 = vadd.f32 %v659_v43, %v602_v38 }
 0x36c   : > { %v661_v44 = vpop.f32.mrf.mxu1  ;;  %v728_v45 = vpop.f32.mrf.mxu0 }
 0x36e   : > { %v662_v46 = vpop.f32.mrf.mxu1  ;;  %v730_v48 = vpop.f32.mrf.mxu0 }
 0x370   : > { %v732_v49 = vpop.f32.mrf.mxu0  ;;  %v772_v52 = vpop.f32.mrf.mxu1 }
 0x371   : > { %v773_v60 = vadd.f32 %v772_v52, %v728_v45 }
 0x372   : > { %v733_v53 = vpop.f32.mrf.mxu0  ;;  %v774_v54 = vpop.f32.mrf.mxu1 }
 0x373   : > { %v775_v63 = vadd.f32 %v774_v54, %v730_v48  ;;  %v1081_v53 = vld [vmem:[#allocation7 + $0x1c] sm:$0xf] }
 0x374   : > { %v776_v55 = vpop.f32.mrf.mxu1  ;;  %v818_v56 = vpop.f32.mrf.mxu0 }
 0x375   : > { %v825_v2 = vadd.f32 %v818_v56, %v773_v60 }
 0x376   : > { %v777_v58 = vpop.f32.mrf.mxu1  ;;  %v820_v59 = vpop.f32.mrf.mxu0 }
 0x377   : > { %v826_v6 = vadd.f32 %v820_v59, %v775_v63  ;;  %v1136_v58 = vld [vmem:[#allocation7 + $0x20] sm:$0xf]  ;;  %v1191_v63 = vld [vmem:[#allocation7 + $0x24] sm:$0xf] }
 0x378   : > { %v822_v61 = vpop.f32.mrf.mxu0  ;;  %v877_v62 = vpop.f32.mrf.mxu1 }
 0x379   : > { %v884_v7 = vadd.f32 %v877_v62, %v825_v2 }
 0x37a   : > { %v823_v3 = vpop.f32.mrf.mxu0  ;;  %v879_v5 = vpop.f32.mrf.mxu1 }
 0x37b   : > { %v885_v16 = vadd.f32 %v879_v5, %v826_v6 }
 0x37c   : > { %v881_v12 = vpop.f32.mrf.mxu1  ;;  %v937_v13 = vpop.f32.mrf.mxu0 }
 0x37d   : > { %v944_v17 = vadd.f32 %v937_v13, %v884_v7 }
 0x37e   : > { %v882_v19 = vpop.f32.mrf.mxu1  ;;  %v939_v21 = vpop.f32.mrf.mxu0 }
 0x37f   : > { %v950_v22 = vadd.f32 %v948_v10, %v944_v17  ;;  %v945_v23 = vadd.f32 %v939_v21, %v885_v16 }
 0x380   : > { %v941_v24 = vpop.f32.mrf.mxu0 }
 0x381   : > { %954 = vrot.lane.b32.xlu1 %v950_v22, %s1801_s26  ;;  %v951_v14 = vadd.f32 %v948_v10, %v945_v23 }
 0x382   : > { %v942_v25 = vpop.f32.mrf.mxu0 }
 0x385   : > { %956 = vrot.lane.b32.xlu1 %v951_v14, %s1801_s26  ;;  %s1692_s26 = scalar_lea.vmem %s1691_s19, 256 }
 0x3f3   : > { %v955_v26 = vpop.permute.xlu1 %954 }
 0x3f4   : > { %v962_v15 = vsel %vm2056_vm6, %v955_v26, 0.0 }
 0x3f5   : > { %v2131_v27 = vadd.f32 %v962_v15, %v1993_v0 }
 0x3f7   : > { %v966_v8 = vmul.f32 0.1, %v2131_v27  ;;  %v957_v9 = vpop.permute.xlu1 %956 }
 0x3f8   : > { %v959_v29 = vsel %vm958_vm14, %v955_v26, %v957_v9 }
 0x3f9   : > { %v968_v20 = vmax.f32 %v2131_v27, %v966_v8  ;;  %v963_v30 = vsel %vm2065_vm10, %v959_v29, 0.0 }
 0x3fa   : > { %v2140_v31 = vadd.f32 %v963_v30, %v1995_v1  ;;  %v1805_v1 = vmov 3  }
 0x3fb   : > { %v970_v0 = vpack.c.bf16 %v968_v20, %v968_v20  ;;  %1604 = vset.pattern.permute.xlu1 %v1805_v1 }
 0x3fc   : > { %v967_v32 = vmul.f32 0.1, %v2140_v31 }
 0x3fd   : > { %978 = vrot.lane.b32.xlu0 %v970_v0, %s1799_s24 }
 0x3fe   : > { %v969_v33 = vmax.f32 %v2140_v31, %v967_v32 }
 0x400   : > { %v971_v34 = vpack.c.bf16 %v969_v33, %v969_v33 }
 0x401   : > { %1029 = vrot.lane.b32.xlu0 %v970_v0, %s1795_s25 }
 0x402   : > { %980 = vrot.lane.b32.xlu1 %v971_v34, %s1799_s24  ;;  %s1686_s24 = scalar_lea.vmem %s1289_s29, 128 }
 0x403   : > { %p1687_p8 = scmp.ne.s32.totalorder %s1289_s29, %s1686_s24  ;;  %p1694_p13 = scmp.lt.s32.totalorder %s1692_s26, %s1686_s24 }
 0x405   : > { %1082 = vrot.lane.b32.xlu0 %v970_v0, %s1806_s7  ;;  %p1688_p9 = pnand %p1687_p8, %p1948_p5  ;;  %p1695_p3 = por %p1694_p13, %p1693_p12 }
 0x406   : > { %1031 = vrot.lane.b32.xlu1 %v971_v34, %s1795_s25  ;;  %s1439_s25 = sshll.u32 %s1284_s4, 7 }
 0x407   : > { %s2200_s14 = scalar_lea.hbm %s2287_s13, %s1439_s25  ;;  %p1689_p2 = pneg %p1688_p9 }
 0x409   : > { %1137 = vrot.lane.b32.xlu0 %v970_v0, %s1807_s11  ;;  %p1696_p0 = pnand %p1695_p3, %p1689_p2 }
 0x40a   : > { %1084 = vrot.lane.b32.xlu1 %v971_v34, %s1806_s7 }
 0x40d   : > { %1192 = vrot.lane.b32.xlu0 %v970_v0, %s1808_s2 }
 0x40e   : > { %1139 = vrot.lane.b32.xlu1 %v971_v34, %s1807_s11 }
 0x411   : > { %667 = vperm.xlu0 %1603, %v2027_v11  }
 0x412   : > { %1194 = vrot.lane.b32.xlu1 %v971_v34, %s1808_s2 }
 0x415   : > { %1605 = vset.pattern.permute.xlu0 %v1805_v1 }
 0x416   : > { %1246 = vperm.xlu1 %1604, %v2027_v11   ;;  %v973_v11 = vld [vmem:[#allocation7 + $0x14] sm:$0xf] }
 0x46f   : > { %v979_v35 = vpop.permute.xlu0 %978 }
 0x473   : > { %v1030_v36 = vpop.permute.xlu0 %1029 }
 0x474   : > { %v981_v37 = vpop.permute.xlu1 %980 }
 0x475   : > { %v982_v38 = vsel %vm892_vm13, %v979_v35, %v981_v37 }
 0x476   : > { %v987_v39 = vsel %vm299_vm0, %v982_v38, 0 }
 0x477   : > { %1453 = vmatpush3.bf16.msra.mxu1 %v987_v39  ;;  %v1083_v42 = vpop.permute.xlu0 %1082 }
 0x478   : > { %v1032_v43 = vpop.permute.xlu1 %1031  ;;  %1464 = vmatprep.subr.bf16.mxu1 %v1803_v28 }
 0x479   : > { %v1033_v44 = vsel %vm403_vm3, %v1030_v36, %v1032_v43  ;;  %vm1141_vm3 = vcmask 982016  }
 0x47a   : > { %v1038_v45 = vsel %vm299_vm0, %v1033_v44, 0  ;;  %1455 = vmatmul.mubr.msk.bf16.vlgmr.msra.gmra.mxu1 %vm295_vm1, %v975_v40 }
 0x47b   : > { %1459 = vmatpush3.bf16.msra.mxu0 %v1038_v45  ;;  %1466 = vmatprep.mubr.msk.bf16.mxu1 %vm1804_vm15, %v1803_v28  ;;  %v1138_v49 = vpop.permute.xlu0 %1137 }
 0x47c   : > { %v1085_v46 = vpop.permute.xlu1 %1084  ;;  %1470 = vmatprep.subr.bf16.mxu0 %v1803_v28 }
 0x47d   : > { %v1087_v48 = vsel %vm1086_vm2, %v1083_v42, %v1085_v46 }
 0x47e   : > { %v1092_v52 = vsel %vm299_vm0, %v1087_v48, 0  ;;  %1461 = vmatmul.mubr.msk.bf16.vlgmr.msra.gmra.mxu0 %vm295_vm1, %v973_v11 }
 0x47f   : > { %1465 = vmatpush3.bf16.msra.mxu1 %v1092_v52  ;;  %1472 = vmatprep.mubr.msk.bf16.mxu0 %vm1804_vm15, %v1803_v28  ;;  %v1193_v59 = vpop.permute.xlu0 %1192 }
 0x480   : > { %v1140_v54 = vpop.permute.xlu1 %1139  ;;  %1476 = vmatprep.subr.bf16.mxu1 %v1803_v28 }
 0x481   : > { %v1142_v55 = vsel %vm1141_vm3, %v1138_v49, %v1140_v54 }
 0x482   : > { %v1147_v56 = vsel %vm299_vm0, %v1142_v55, 0  ;;  %1467 = vmatmul.mubr.msk.bf16.vlgmr.msra.gmra.mxu1 %vm295_vm1, %v1081_v53 }
 0x483   : > { %1471 = vmatpush3.bf16.msra.mxu0 %v1147_v56  ;;  %1478 = vmatprep.mubr.msk.bf16.mxu1 %vm1804_vm15, %v1803_v28 }
 0x484   : > { %v1195_v60 = vpop.permute.xlu1 %1194 }
 0x485   : > { %v1197_v61 = vsel %vm1196_vm4, %v1193_v59, %v1195_v60 }
 0x486   : > { %v1202_v62 = vsel %vm299_vm0, %v1197_v61, 0  ;;  %1473 = vmatmul.mubr.msk.bf16.vlgmr.msra.gmra.mxu0 %vm295_vm1, %v1136_v58  ;;  %vm678_vm0 = vcmask 23552  }
 0x487   : > { %1477 = vmatpush3.bf16.msra.mxu1 %v1202_v62 }
 0x48a   : > { %1479 = vmatmul.mubr.msk.bf16.vlgmr.msra.gmra.mxu1 %vm295_vm1, %v1191_v63 }
 0x48c   : > { %v668_v2 = vpop.permute.xlu0 %667 }
 0x48d   : > { %v670_v3 = vadd.f32 %v668_v2, %v2124_v41  ;;  %v671_v5 = vadd.f32 %v668_v2, %v2126_v4 }
 0x48f   : > { %676 = vrot.lane.b32.xlu0 %v671_v5, %s1809_s6  ;;  %674 = vrot.lane.b32.xlu1 %v670_v3, %s1809_s6 }
 0x491   : > { %v1247_v8 = vpop.permute.xlu1 %1246 }
 0x501   : > { %v677_v32 = vpop.permute.xlu0 %676  ;;  %v675_v33 = vpop.permute.xlu1 %674 }
 0x502   : > { %v679_v34 = vsel %vm678_vm0, %v675_v33, %v677_v32  ;;  %v682_v1 = vsel %vm2056_vm6, %v675_v33, 0.0 }
 0x503   : > { %v683_v35 = vsel %vm2065_vm10, %v679_v34, 0.0  ;;  %v684_v39 = vadd.f32 %v682_v1, %v2063_v50 }
 0x504   : > { %v685_v40 = vadd.f32 %v683_v35, %v2074_v57 }
 0x53a   : > { %v1023_v6 = vpop.f32.mrf.mxu1 }
 0x53c   : > { %v1456_v7 = vpop.f32.mrf.mxu1 }
 0x53e   : > { %v1026_v10 = vpop.f32.mrf.mxu1  ;;  %v1074_v12 = vpop.f32.mrf.mxu0 }
 0x53f   : > { %v1075_v23 = vadd.f32 %v1074_v12, %v1023_v6 }
 0x540   : > { %v1457_v13 = vpop.f32.mrf.mxu1  ;;  %v1462_v16 = vpop.f32.mrf.mxu0 }
 0x542   : > { %v1077_v17 = vpop.f32.mrf.mxu0  ;;  %v1128_v19 = vpop.f32.mrf.mxu1 }
 0x543   : > { %v1134_v14 = vadd.f32 %v1128_v19, %v1075_v23 }
 0x544   : > { %v1463_v21 = vpop.f32.mrf.mxu0  ;;  %v1468_v22 = vpop.f32.mrf.mxu1 }
 0x546   : > { %v1131_v24 = vpop.f32.mrf.mxu1  ;;  %v1183_v25 = vpop.f32.mrf.mxu0 }
 0x547   : > { %v1189_v4 = vadd.f32 %v1183_v25, %v1134_v14 }
 0x548   : > { %v1469_v41 = vpop.f32.mrf.mxu1  ;;  %v1474_v18 = vpop.f32.mrf.mxu0 }
 0x54a   : > { %v1238_v26 = vpop.f32.mrf.mxu1  ;;  %v1186_v15 = vpop.f32.mrf.mxu0 }
 0x54b   : > { %v1244_v9 = vadd.f32 %v1238_v26, %v1189_v4 }
 0x54c   : > { %v1480_v28 = vpop.f32.mrf.mxu1  ;;  %v1475_v29 = vpop.f32.mrf.mxu0 }
 0x54d   : > { %v1249_v20 = vadd.f32 %v1247_v8, %v1244_v9 }
 0x54e   : > { %v1241_v30 = vpop.f32.mrf.mxu1 }
 0x54f   : > { %1251 = vrot.lane.b32.xlu1 %v1249_v20, %s1810_s12 }
 0x550   : > { %v1481_v0 = vpop.f32.mrf.mxu1 }
 0x5c1   : > { %v1252_v36 = vpop.permute.xlu1 %1251 }
 0x5c2   : > { %v1254_v37 = vsel %vm2056_vm6, %v1252_v36, 0.0  ;;  %v1255_v38 = vsel %vm2065_vm10, %v1252_v36, 0.0 }
 0x5c3   : > { %v1256_v42 = vadd.f32 %v1254_v37, %v2131_v27  ;;  %v1257_v43 = vadd.f32 %v1255_v38, %v2140_v31 }
 0x5c5   : > { %v1259_v44 = vadd.f32 %v1257_v43, %v685_v40  ;;  %v1258_v45 = vadd.f32 %v1256_v42, %v684_v39 }
 0x5c7   : > { %v1261_v11 = vmul.f32 0.5, %v1259_v44  ;;  %v1260_v46 = vmul.f32 0.5, %v1258_v45 }
 0x5c9   : > { %1266 = vrot.lane.b32.xlu1 %v1261_v11, %s1806_s7  ;;  %1264 = vrot.lane.b32.xlu0 %v1260_v46, %s1806_s7 }
 0x63b   : > { %v1267_v47 = vpop.permute.xlu1 %1266  ;;  %v1265_v50 = vpop.permute.xlu0 %1264 }
 0x63c   : > { %v1269_v51 = vsel %vm1086_vm2, %v1265_v50, %v1267_v47 }
 0x63d   : > { %1271 = vst [vmem:[%s260_s27] sm:$0xff] %v1269_v51 }
 0x63e   : > { %1699 = shalt.err (!%p1696_p0)
}
 0x63f   : > { %s1700_s7 = scalar_lea.hbm %s2200_s14, 128  ;;  %s1704_s2 = scalar_lea.hbm %s2287_s13, 512 }
 0x640   : > { %p1701_p1 = scmp.ne.s32.totalorder %s2200_s14, %s1700_s7  ;;  %p1705_p10 = scmp.lt.s32.totalorder %s2200_s14, %s2287_s13 }
 0x641   : > { %p1706_p11 = scmp.lt.s32.totalorder %s1704_s2, %s1700_s7 }
 0x642   : > { %p1702_p4 = pnand %p1701_p1, %p1948_p5 }
 0x643   : > { %p1707_p7 = por %p1706_p11, %p1705_p10 }
 0x644   : > { %p1703_p6 = pneg %p1702_p4 }
 0x646   : > { %p1708_p8 = pnand %p1707_p7, %p1703_p6 }
 0x648   : > { %1711 = shalt.err (!%p1708_p8)
}
 0x649   : > { %1492 = dma.vmem_to_hbm [thread:$0]  (%p1948_p5), %s1289_s29, 128, %s2200_s14, %s1273_s23  }
 0x64a PF: > { %s2288_s30 = sld [smem:[#allocation12_spill]]  ;;  %p1514_p9 = scmp.ge.s32.totalorder %s1786_s22, 2 }
 0x64b   : > { %s2289_s9 = sld [smem:[#allocation13_spill]] }
 0x650   : > { %s1300_s4 = sand.u32 1, %s2288_s30  }
 0x651   : > { %p2290_p2 = scmp.ne.s32.totalorder %s2289_s9, 0  ;;  %s1301_s25 = scalar_lea.sflag [#allocation4], %s1300_s4 }
 0x653   : > { %p1506_p12 = pnand %p1514_p9, %p2290_p2 }
 0x655   : > { %p1507_p13 = pneg %p1506_p12 }
 0x657   : > { %1753 = dma.done.wait (%p1507_p13), %s1301_s25, 128  }
 0x658   : > { %1755 = vsyncadd (%p1507_p13), %s1301_s25, 4294967168  ;;  %s21_s22 = sadd.s32 1, %s1786_s22   ;;  %s2291_s28 = sld [smem:[#allocation14_spill]] }
 0x659   : > { %p18_p3 = scmp.ge.s32.totalorder %s21_s22, 6   ;;  %s2292_s15 = smov %s1762_s16 }
 0x65a   : > { %s2293_s16 = smov %s1766_s17  ;;  %s2294_s17 = smov %s1961_s3 }
 0x65b   : > { %s2295_s18 = smov %s1778_s20  ;;  %s2296_s19 = smov %s1782_s21 }
 0x65c   : > { %s2298_s21 = smov %s2304_s5  ;;  %20 = sbr.rel (!%p18_p3) target bundleno = 12 (0xc), region = 103 }
 0x65e   : > { %s2297_s20 = smov %s2291_s28 }
 0x661   :  { %1306 = vsyncpa [#allocation3], 1 }
 0x662   :  { %1308 = vsyncpa [#allocation3 + $0x1], 1 }
 0x663   :  { %1309 = vsyncpa [#allocation6], 1 }
 0x664   :  { %1310 = vsyncpa [#allocation4], 1 }
 0x665   :  { %1312 = vsyncpa [#allocation4 + $0x1], 1 }

</bundles_post_ra>
